<compile_context>
chip_gen: v6e
topology: v6e:2x2x1
jax: 0.10.0
libtpu: 0.0.40
codegen_flags: <defaults>
</compile_context>

<pallas_src>
import functools

import jax
import jax.numpy as jnp
from jax import lax
from jax.experimental import pallas as pl
from jax.experimental.pallas import tpu as pltpu


# ----------------------------- Pallas kernel -------------------------------

def _style_loss_kernel(a_ref, w_ref, b_ref, loss_ref,
                       fx_scr, fy_scr, gx_acc, gy_acc,
                       *, n_imgs, cout, inv_div):
    # a:    (2N, Cin*9, ts) bf16 im2col patches (K on sublanes, spatial on lanes)
    # w:    (Cout, Cin*9)   bf16
    # b:    (Cout, 1)       f32
    # loss: (1, 1)          f32 (written once, on the last grid step)
    # fx/fy_scr: (N*Cout, ts) bf16 feature slabs for this spatial tile
    # gx/gy_acc: (N*Cout, N*Cout) f32 gram accumulators (live across the grid)
    s = pl.program_id(0)

    @pl.when(s == 0)
    def _():
        gx_acc[...] = jnp.zeros_like(gx_acc)
        gy_acc[...] = jnp.zeros_like(gy_acc)

    w = w_ref[...]
    b = b_ref[...]

    # Conv3x3 + bias + ReLU for every image of this spatial tile (MXU matmuls).
    for i in range(n_imgs):
        fx = jnp.dot(w, a_ref[i], preferred_element_type=jnp.float32)
        fx = jnp.maximum(fx + b, 0.0)
        fx_scr[pl.ds(i * cout, cout), :] = fx.astype(fx_scr.dtype)

        fy = jnp.dot(w, a_ref[n_imgs + i], preferred_element_type=jnp.float32)
        fy = jnp.maximum(fy + b, 0.0)
        fy_scr[pl.ds(i * cout, cout), :] = fy.astype(fy_scr.dtype)

    # Partial gram accumulation: G += F @ F.T, contracting the lane (spatial)
    # axis of both operands (no materialized transpose).
    dn = (((1,), (1,)), ((), ()))
    fxs = fx_scr[...]
    fys = fy_scr[...]
    gx_acc[...] += lax.dot_general(fxs, fxs, dimension_numbers=dn,
                                   preferred_element_type=jnp.float32)
    gy_acc[...] += lax.dot_general(fys, fys, dimension_numbers=dn,
                                   preferred_element_type=jnp.float32)

    @pl.when(s == pl.num_programs(0) - 1)
    def _():
        d = (gx_acc[...] - gy_acc[...]) * inv_div
        n_elem = d.shape[0] * d.shape[1]
        loss_ref[...] = jnp.sum(d * d, axis=(0, 1), keepdims=True) / n_elem


# ------------------------------- Wrapper ------------------------------------

def _pick_tile(total, target, align=128):
    """Largest multiple of `align` <= target that divides `total` (else total)."""
    if total % align != 0:
        return total
    t = min(target, total)
    t -= t % align
    while t > 0 and total % t != 0:
        t -= align
    return t if t > 0 else total


def style_loss_pallas(x, y, w_oihw, bias, *, spatial_tile=2048):
    """MSE between gram matrices of VGG19-slice1 features of x and y."""
    N, C, H, W = x.shape
    Cout = w_oihw.shape[0]
    Kc = C * 9
    HW = H * W
    M = N * Cout

    # im2col (XLA glue, bf16): columns ordered (c_in, kh, kw); spatial (h, w).
    imgs = jnp.concatenate([x, y], axis=0).astype(jnp.bfloat16)      # (2N,C,H,W)
    xp = jnp.pad(imgs, ((0, 0), (0, 0), (1, 1), (1, 1)))
    patches = jnp.stack(
        [xp[:, :, kh:kh + H, kw:kw + W] for kh in range(3) for kw in range(3)],
        axis=2)                                                       # (2N,C,9,H,W)
    a = patches.reshape(2 * N, Kc, HW)                                # (2N,27,HW)
    w_mat = w_oihw.reshape(Cout, Kc).astype(jnp.bfloat16)             # (Cout,27)
    b_col = bias.reshape(Cout, 1).astype(jnp.float32)

    ts = _pick_tile(HW, spatial_tile)
    grid = (HW // ts,)
    inv_div = 1.0 / float(M * HW)

    cost = pl.CostEstimate(
        flops=2 * (2 * N) * HW * Kc * Cout + 2 * 2 * M * M * HW,
        transcendentals=0,
        bytes_accessed=a.size * 2 + w_mat.size * 2 + b_col.size * 4 + 4)

    kern = functools.partial(_style_loss_kernel, n_imgs=N, cout=Cout,
                             inv_div=inv_div)
    loss = pl.pallas_call(
        kern,
        out_shape=jax.ShapeDtypeStruct((1, 1), jnp.float32),
        grid=grid,
        in_specs=[
            pl.BlockSpec((2 * N, Kc, ts), lambda s: (0, 0, s)),
            pl.BlockSpec((Cout, Kc), lambda s: (0, 0)),
            pl.BlockSpec((Cout, 1), lambda s: (0, 0)),
        ],
        out_specs=pl.BlockSpec((1, 1), lambda s: (0, 0)),
        scratch_shapes=[
            pltpu.VMEM((M, ts), jnp.bfloat16),   # fx slab for this tile
            pltpu.VMEM((M, ts), jnp.bfloat16),   # fy slab for this tile
            pltpu.VMEM((M, M), jnp.float32),     # gram(x) accumulator
            pltpu.VMEM((M, M), jnp.float32),     # gram(y) accumulator
        ],
        compiler_params=pltpu.CompilerParams(
            dimension_semantics=("arbitrary",)),
        cost_estimate=cost,
    )(a, w_mat, b_col)
    return loss[0, 0]


class StyleLossPallas:
    def __init__(self, key):
        k1, k2 = jax.random.split(key)
        # VGG19 features[0]: Conv2d(3, 64, kernel_size=3, padding=1), OIHW.
        self.w = jax.random.normal(k1, (64, 3, 3, 3), jnp.float32) * 0.1
        self.b = jax.random.normal(k2, (64,), jnp.float32) * 0.1

    def __call__(self, x, y):
        return style_loss_pallas(x, y, self.w, self.b)


# ------------------------------ References (JAX) ----------------------------

def _reference_loss_f32(x, y, w, b):
    """PyTorch-semantics reference in pure f32."""
    def feat(img):
        out = lax.conv_general_dilated(
            img, w, window_strides=(1, 1), padding=((1, 1), (1, 1)),
            dimension_numbers=("NCHW", "OIHW", "NCHW"))
        return jnp.maximum(out + b.reshape(1, -1, 1, 1), 0.0)

    def gram(f):
        a_, b_, c_, d_ = f.shape
        F = f.reshape(a_ * b_, c_ * d_)
        return (F @ F.T) / (a_ * b_ * c_ * d_)

    gx, gy = gram(feat(x)), gram(feat(y))
    return jnp.mean((gx - gy) ** 2)


def _reference_loss_bf16(x, y, w, b):
    """Same dtype strategy as the Pallas path (bf16 operands, f32 accumulate)."""
    N, C, H, W = x.shape
    Cout = w.shape[0]

    def feat(img):
        xp = jnp.pad(img, ((0, 0), (0, 0), (1, 1), (1, 1)))
        patches = jnp.stack(
            [xp[:, :, kh:kh + H, kw:kw + W]
             for kh in range(3) for kw in range(3)], axis=2)
        a = patches.reshape(N, C * 9, H * W).astype(jnp.bfloat16)
        wm = w.reshape(Cout, C * 9).astype(jnp.bfloat16)
        out = jnp.einsum("ok,nkm->nom", wm, a,
                         preferred_element_type=jnp.float32)
        out = jnp.maximum(out + b.reshape(1, Cout, 1), 0.0)
        return out.astype(jnp.bfloat16)                      # (N, Cout, HW)

    def gram(f):
        F = f.reshape(N * Cout, H * W)
        g = lax.dot_general(F, F, dimension_numbers=(((1,), (1,)), ((), ())),
                            preferred_element_type=jnp.float32)
        return g / (N * Cout * H * W)

    gx, gy = gram(feat(x)), gram(feat(y))
    return jnp.mean((gx - gy) ** 2)


# --------------------------------- Main -------------------------------------

if __name__ == "__main__":
    key = jax.random.PRNGKey(0)
    k_mod, k_x, k_y = jax.random.split(key, 3)

    # Small NCHW inputs consistent with VGG's 3-channel first conv.
    x = jax.random.normal(k_x, (2, 3, 16, 16), jnp.float32)
    y = jax.random.normal(k_y, (2, 3, 16, 16), jnp.float32)

    style_loss = StyleLossPallas(k_mod)
    loss_fn = jax.jit(lambda xi, yi: style_loss(xi, yi))
    loss = jax.block_until_ready(loss_fn(x, y))

    ref_match = jax.block_until_ready(
        _reference_loss_bf16(x, y, style_loss.w, style_loss.b))
    ref_f32 = jax.block_until_ready(
        _reference_loss_f32(x, y, style_loss.w, style_loss.b))

    assert jnp.isfinite(loss), "loss is not finite"
    # Tight check against a dtype-matched reference (kernel mechanics).
    assert jnp.allclose(loss, ref_match, rtol=1e-2, atol=1e-12), (loss, ref_match)
    # Loose check against the full-precision PyTorch-semantics reference
    # (bf16 carriage is the only deviation).
    assert jnp.allclose(loss, ref_f32, rtol=1e-1, atol=1e-12), (loss, ref_f32)

    print("KERNEL_OK")
</pallas_src>

<mosaic_0001>
module attributes {stable_mosaic.version = 11 : i64} {
  func.func @_style_loss_kernel(%arg0: i32, %arg1: memref<4x27x256xbf16, #tpu.memory_space<vmem>>, %arg2: memref<64x27xbf16, #tpu.memory_space<vmem>>, %arg3: memref<64x1xf32, #tpu.memory_space<vmem>>, %arg4: memref<1x1xf32, #tpu.memory_space<vmem>>, %arg5: memref<128x256xbf16, #tpu.memory_space<vmem>>, %arg6: memref<128x256xbf16, #tpu.memory_space<vmem>>, %arg7: memref<128x128xf32, #tpu.memory_space<vmem>>, %arg8: memref<128x128xf32, #tpu.memory_space<vmem>>) attributes {dimension_semantics = [#tpu.dimension_semantics<arbitrary>], iteration_bounds = array<i64: 1>, scalar_prefetch = 0 : i64, scratch_operands = 4 : i64, tpu.core_type = #tpu.core_type<tc>, window_params = [{transform_indices = @transform_0, window_bounds = array<i64: 4, 27, 256>}, {pipeline_mode = #tpu.pipeline_mode<synchronous>, transform_indices = @transform_1, window_bounds = array<i64: 64, 27>}, {pipeline_mode = #tpu.pipeline_mode<synchronous>, transform_indices = @transform_2, window_bounds = array<i64: 64, 1>}, {pipeline_mode = #tpu.pipeline_mode<synchronous>, transform_indices = @transform_3, window_bounds = array<i64: 1, 1>}]} {
    %c0_i32 = arith.constant 0 : i32
    %0 = arith.cmpi eq, %arg0, %c0_i32 : i32
    %1 = arith.extui %0 : i1 to i32
    %c0_i32_0 = arith.constant 0 : i32
    %2 = arith.cmpi ne, %1, %c0_i32_0 : i32
    scf.if %2 {
      %cst_43 = arith.constant 0.000000e+00 : f32
      %54 = vector.broadcast %cst_43 : f32 to vector<128x128xf32>
      %c0_44 = arith.constant 0 : index
      %c0_45 = arith.constant 0 : index
      %55 = vector.load %arg7[%c0_44, %c0_45] : memref<128x128xf32, #tpu.memory_space<vmem>>, vector<128x128xf32>
      tpu.vector_store %arg7[%c0_44, %c0_45], %54 {strides = array<i32>} : memref<128x128xf32, #tpu.memory_space<vmem>>, vector<128x128xf32>,
      %cst_46 = arith.constant 0.000000e+00 : f32
      %56 = vector.broadcast %cst_46 : f32 to vector<128x128xf32>
      %c0_47 = arith.constant 0 : index
      %c0_48 = arith.constant 0 : index
      %57 = vector.load %arg8[%c0_47, %c0_48] : memref<128x128xf32, #tpu.memory_space<vmem>>, vector<128x128xf32>
      tpu.vector_store %arg8[%c0_47, %c0_48], %56 {strides = array<i32>} : memref<128x128xf32, #tpu.memory_space<vmem>>, vector<128x128xf32>,
    } else {
    }
    %c0 = arith.constant 0 : index
    %c0_1 = arith.constant 0 : index
    %3 = vector.load %arg2[%c0, %c0_1] : memref<64x27xbf16, #tpu.memory_space<vmem>>, vector<64x27xbf16>
    %c0_2 = arith.constant 0 : index
    %c0_3 = arith.constant 0 : index
    %4 = vector.load %arg3[%c0_2, %c0_3] : memref<64x1xf32, #tpu.memory_space<vmem>>, vector<64x1xf32>
    %c0_4 = arith.constant 0 : index
    %c0_5 = arith.constant 0 : index
    %c0_6 = arith.constant 0 : index
    %5 = vector.load %arg1[%c0_4, %c0_5, %c0_6] : memref<4x27x256xbf16, #tpu.memory_space<vmem>>, vector<1x27x256xbf16>
    %6 = vector.shape_cast %5 : vector<1x27x256xbf16> to vector<27x256xbf16>
    %cst = arith.constant dense<0.000000e+00> : vector<64x256xf32>
    %7 = tpu.matmul %3, %6, %cst {dimension_numbers = #tpu.dot_dimension_numbers<[1], [0], [0], [1], [0, 0, 1, 1], [], []>} : vector<64x27xbf16>, vector<27x256xbf16>, vector<64x256xf32> -> vector<64x256xf32>
    %8 = vector.broadcast %4 : vector<64x1xf32> to vector<64x256xf32>
    %9 = arith.addf %7, %8 : vector<64x256xf32>
    %cst_7 = arith.constant 0.000000e+00 : f32
    %10 = vector.broadcast %cst_7 : f32 to vector<64x256xf32>
    %11 = arith.maximumf %9, %10 : vector<64x256xf32>
    %12 = arith.truncf %11 : vector<64x256xf32> to vector<64x256xbf16>
    %c0_8 = arith.constant 0 : index
    %c0_9 = arith.constant 0 : index
    %13 = vector.load %arg5[%c0_8, %c0_9] : memref<128x256xbf16, #tpu.memory_space<vmem>>, vector<64x256xbf16>
    tpu.vector_store %arg5[%c0_8, %c0_9], %12 {strides = array<i32>} : memref<128x256xbf16, #tpu.memory_space<vmem>>, vector<64x256xbf16>,
    %c2 = arith.constant 2 : index
    %c0_10 = arith.constant 0 : index
    %c0_11 = arith.constant 0 : index
    %14 = vector.load %arg1[%c2, %c0_10, %c0_11] : memref<4x27x256xbf16, #tpu.memory_space<vmem>>, vector<1x27x256xbf16>
    %15 = vector.shape_cast %14 : vector<1x27x256xbf16> to vector<27x256xbf16>
    %cst_12 = arith.constant dense<0.000000e+00> : vector<64x256xf32>
    %16 = tpu.matmul %3, %15, %cst_12 {dimension_numbers = #tpu.dot_dimension_numbers<[1], [0], [0], [1], [0, 0, 1, 1], [], []>} : vector<64x27xbf16>, vector<27x256xbf16>, vector<64x256xf32> -> vector<64x256xf32>
    %17 = vector.broadcast %4 : vector<64x1xf32> to vector<64x256xf32>
    %18 = arith.addf %16, %17 : vector<64x256xf32>
    %cst_13 = arith.constant 0.000000e+00 : f32
    %19 = vector.broadcast %cst_13 : f32 to vector<64x256xf32>
    %20 = arith.maximumf %18, %19 : vector<64x256xf32>
    %21 = arith.truncf %20 : vector<64x256xf32> to vector<64x256xbf16>
    %c0_14 = arith.constant 0 : index
    %c0_15 = arith.constant 0 : index
    %22 = vector.load %arg6[%c0_14, %c0_15] : memref<128x256xbf16, #tpu.memory_space<vmem>>, vector<64x256xbf16>
    tpu.vector_store %arg6[%c0_14, %c0_15], %21 {strides = array<i32>} : memref<128x256xbf16, #tpu.memory_space<vmem>>, vector<64x256xbf16>,
    %c1 = arith.constant 1 : index
    %c0_16 = arith.constant 0 : index
    %c0_17 = arith.constant 0 : index
    %23 = vector.load %arg1[%c1, %c0_16, %c0_17] : memref<4x27x256xbf16, #tpu.memory_space<vmem>>, vector<1x27x256xbf16>
    %24 = vector.shape_cast %23 : vector<1x27x256xbf16> to vector<27x256xbf16>
    %cst_18 = arith.constant dense<0.000000e+00> : vector<64x256xf32>
    %25 = tpu.matmul %3, %24, %cst_18 {dimension_numbers = #tpu.dot_dimension_numbers<[1], [0], [0], [1], [0, 0, 1, 1], [], []>} : vector<64x27xbf16>, vector<27x256xbf16>, vector<64x256xf32> -> vector<64x256xf32>
    %26 = vector.broadcast %4 : vector<64x1xf32> to vector<64x256xf32>
    %27 = arith.addf %25, %26 : vector<64x256xf32>
    %cst_19 = arith.constant 0.000000e+00 : f32
    %28 = vector.broadcast %cst_19 : f32 to vector<64x256xf32>
    %29 = arith.maximumf %27, %28 : vector<64x256xf32>
    %30 = arith.truncf %29 : vector<64x256xf32> to vector<64x256xbf16>
    %c64 = arith.constant 64 : index
    %c0_20 = arith.constant 0 : index
    %31 = vector.load %arg5[%c64, %c0_20] : memref<128x256xbf16, #tpu.memory_space<vmem>>, vector<64x256xbf16>
    tpu.vector_store %arg5[%c64, %c0_20], %30 {strides = array<i32>} : memref<128x256xbf16, #tpu.memory_space<vmem>>, vector<64x256xbf16>,
    %c3 = arith.constant 3 : index
    %c0_21 = arith.constant 0 : index
    %c0_22 = arith.constant 0 : index
    %32 = vector.load %arg1[%c3, %c0_21, %c0_22] : memref<4x27x256xbf16, #tpu.memory_space<vmem>>, vector<1x27x256xbf16>
    %33 = vector.shape_cast %32 : vector<1x27x256xbf16> to vector<27x256xbf16>
    %cst_23 = arith.constant dense<0.000000e+00> : vector<64x256xf32>
    %34 = tpu.matmul %3, %33, %cst_23 {dimension_numbers = #tpu.dot_dimension_numbers<[1], [0], [0], [1], [0, 0, 1, 1], [], []>} : vector<64x27xbf16>, vector<27x256xbf16>, vector<64x256xf32> -> vector<64x256xf32>
    %35 = vector.broadcast %4 : vector<64x1xf32> to vector<64x256xf32>
    %36 = arith.addf %34, %35 : vector<64x256xf32>
    %cst_24 = arith.constant 0.000000e+00 : f32
    %37 = vector.broadcast %cst_24 : f32 to vector<64x256xf32>
    %38 = arith.maximumf %36, %37 : vector<64x256xf32>
    %39 = arith.truncf %38 : vector<64x256xf32> to vector<64x256xbf16>
    %c64_25 = arith.constant 64 : index
    %c0_26 = arith.constant 0 : index
    %40 = vector.load %arg6[%c64_25, %c0_26] : memref<128x256xbf16, #tpu.memory_space<vmem>>, vector<64x256xbf16>
    tpu.vector_store %arg6[%c64_25, %c0_26], %39 {strides = array<i32>} : memref<128x256xbf16, #tpu.memory_space<vmem>>, vector<64x256xbf16>,
    %c0_27 = arith.constant 0 : index
    %c0_28 = arith.constant 0 : index
    %41 = vector.load %arg5[%c0_27, %c0_28] : memref<128x256xbf16, #tpu.memory_space<vmem>>, vector<128x256xbf16>
    %c0_29 = arith.constant 0 : index
    %c0_30 = arith.constant 0 : index
    %42 = vector.load %arg6[%c0_29, %c0_30] : memref<128x256xbf16, #tpu.memory_space<vmem>>, vector<128x256xbf16>
    %c0_31 = arith.constant 0 : index
    %c0_32 = arith.constant 0 : index
    %43 = vector.load %arg7[%c0_31, %c0_32] : memref<128x128xf32, #tpu.memory_space<vmem>>, vector<128x128xf32>
    %cst_33 = arith.constant dense<0.000000e+00> : vector<128x128xf32>
    %44 = tpu.matmul %41, %41, %cst_33 {dimension_numbers = #tpu.dot_dimension_numbers<[1], [1], [0], [0], [0, 0, 1, 0], [], []>} : vector<128x256xbf16>, vector<128x256xbf16>, vector<128x128xf32> -> vector<128x128xf32>
    %45 = arith.addf %43, %44 : vector<128x128xf32>
    %c0_34 = arith.constant 0 : index
    %c0_35 = arith.constant 0 : index
    %46 = vector.load %arg7[%c0_34, %c0_35] : memref<128x128xf32, #tpu.memory_space<vmem>>, vector<128x128xf32>
    tpu.vector_store %arg7[%c0_34, %c0_35], %45 {strides = array<i32>} : memref<128x128xf32, #tpu.memory_space<vmem>>, vector<128x128xf32>,
    %c0_36 = arith.constant 0 : index
    %c0_37 = arith.constant 0 : index
    %47 = vector.load %arg8[%c0_36, %c0_37] : memref<128x128xf32, #tpu.memory_space<vmem>>, vector<128x128xf32>
    %cst_38 = arith.constant dense<0.000000e+00> : vector<128x128xf32>
    %48 = tpu.matmul %42, %42, %cst_38 {dimension_numbers = #tpu.dot_dimension_numbers<[1], [1], [0], [0], [0, 0, 1, 0], [], []>} : vector<128x256xbf16>, vector<128x256xbf16>, vector<128x128xf32> -> vector<128x128xf32>
    %49 = arith.addf %47, %48 : vector<128x128xf32>
    %c0_39 = arith.constant 0 : index
    %c0_40 = arith.constant 0 : index
    %50 = vector.load %arg8[%c0_39, %c0_40] : memref<128x128xf32, #tpu.memory_space<vmem>>, vector<128x128xf32>
    tpu.vector_store %arg8[%c0_39, %c0_40], %49 {strides = array<i32>} : memref<128x128xf32, #tpu.memory_space<vmem>>, vector<128x128xf32>,
    %c0_i32_41 = arith.constant 0 : i32
    %51 = arith.cmpi eq, %arg0, %c0_i32_41 : i32
    %52 = arith.extui %51 : i1 to i32
    %c0_i32_42 = arith.constant 0 : i32
    %53 = arith.cmpi ne, %52, %c0_i32_42 : i32
    scf.if %53 {
      %c0_43 = arith.constant 0 : index
      %c0_44 = arith.constant 0 : index
      %54 = vector.load %arg7[%c0_43, %c0_44] : memref<128x128xf32, #tpu.memory_space<vmem>>, vector<128x128xf32>
      %c0_45 = arith.constant 0 : index
      %c0_46 = arith.constant 0 : index
      %55 = vector.load %arg8[%c0_45, %c0_46] : memref<128x128xf32, #tpu.memory_space<vmem>>, vector<128x128xf32>
      %56 = arith.subf %54, %55 : vector<128x128xf32>
      %cst_47 = arith.constant 3.05175781E-5 : f32
      %57 = vector.broadcast %cst_47 : f32 to vector<128x128xf32>
      %58 = arith.mulf %56, %57 : vector<128x128xf32>
      %59 = arith.mulf %58, %58 : vector<128x128xf32>
      %60 = vector.shape_cast %59 : vector<128x128xf32> to vector<1x128x128xf32>
      %cst_48 = arith.constant dense<0.000000e+00> : vector<1xf32>
      %61 = vector.multi_reduction <add>, %60, %cst_48 [1, 2] : vector<1x128x128xf32> to vector<1xf32>
      %62 = vector.shape_cast %61 : vector<1xf32> to vector<1x1x1xf32>
      %63 = vector.extract %62[0, 0, 0] : f32 from vector<1x1x1xf32>
      %64 = vector.broadcast %63 : f32 to vector<1x1xf32>
      %cst_49 = arith.constant 1.638400e+04 : f32
      %65 = vector.broadcast %cst_49 : f32 to vector<1x1xf32>
      %66 = arith.divf %64, %65 : vector<1x1xf32>
      %c0_50 = arith.constant 0 : index
      %c0_51 = arith.constant 0 : index
      %67 = vector.load %arg4[%c0_50, %c0_51] : memref<1x1xf32, #tpu.memory_space<vmem>>, vector<1x1xf32>
      tpu.vector_store %arg4[%c0_50, %c0_51], %66 {strides = array<i32>} : memref<1x1xf32, #tpu.memory_space<vmem>>, vector<1x1xf32>,
    } else {
    }
    return
  }
  func.func @transform_0(%arg0: i32) -> (i32, i32, i32) {
    %c0_i32 = arith.constant 0 : i32
    %c0_i32_0 = arith.constant 0 : i32
    %c0_i32_1 = arith.constant 0 : i32
    return %c0_i32, %c0_i32_0, %arg0 : i32, i32, i32
  }
  func.func @transform_1(%arg0: i32) -> (i32, i32) {
    %c0_i32 = arith.constant 0 : i32
    %c0_i32_0 = arith.constant 0 : i32
    %c0_i32_1 = arith.constant 0 : i32
    return %c0_i32, %c0_i32_0 : i32, i32
  }
  func.func @transform_2(%arg0: i32) -> (i32, i32) {
    %c0_i32 = arith.constant 0 : i32
    %c0_i32_0 = arith.constant 0 : i32
    %c0_i32_1 = arith.constant 0 : i32
    return %c0_i32, %c0_i32_0 : i32, i32
  }
  func.func @transform_3(%arg0: i32) -> (i32, i32) {
    %c0_i32 = arith.constant 0 : i32
    %c0_i32_0 = arith.constant 0 : i32
    %c0_i32_1 = arith.constant 0 : i32
    return %c0_i32, %c0_i32_0 : i32, i32
  }
}

</mosaic_0001>

<bundles_post_ra>
// kernel: _lambda_.1
= control target key start
LH: loop header
LB: loop body
LE: loop exit
PB: predicated region body
PF: predicated region fallthrough
CT: control target
= control target key end

     0   :  { %vm163_vm0 = vcmask 1044480   ;;  %vm164_vm1 = vcmask 1045504   ;;  %v1681_v1 = vmov 65535   ;;  %v1682_v13 = vmov 0   ;;  %s2056_s0 = inlined_call_operand.vmem [shape: bf16[4,27,256], index: 0, kind: input, shape index: {}]   ;;  %s2057_s1 = inlined_call_operand.vmem [shape: bf16[64,27], index: 1, kind: input, shape index: {}]   ;;  %s2058_s2 = inlined_call_operand.vmem [shape: f32[64,1], index: 2, kind: input, shape index: {}]   ;;  %s2059_s3 = inlined_call_operand.hbm [shape: f32[1,1], index: 3, kind: output, shape index: {}]  }
   0x1   :  { %v1631_v0 = vld [vmem:[%s2056_s0 + $0x14] ss:$8 sps:$4 sm:$0x3f]   ;;  %v165_v2 = vsel %vm163_vm0, 4294967295, %v1681_v1  ;;  %v1637_v6 = vld [vmem:[%s2056_s0 + $0x4] ss:$8 sps:$4 sm:$0xff]   ;;  %205 = vmatprep.mubr.bf16.mxu0 %v1682_v13  ;;  %379 = vmatprep.mubr.bf16.mxu1 %v1682_v13 }
   0x2   :  { %v1633_v3 = vld [vmem:[%s2056_s0 + $0x54] ss:$8 sps:$4 sm:$0x3f]   ;;  %v166_v4 = vsel %vm164_vm1, %v165_v2, 0  ;;  %v1639_v11 = vld [vmem:[%s2056_s0 + $0x44] ss:$8 sps:$4 sm:$0xff]   ;;  %1629 = vset.pattern.permute.xlu0 %v1682_v13  ;;  %1630 = vset.pattern.permute.xlu1 %v1682_v13 }
   0x3   :  { %v1635_v5 = vld [vmem:[%s2056_s0 + $0x10] ss:$8 sps:$4 sm:$0x3f]   ;;  %v171_v7 = vand.u32 %v1631_v0, %v166_v4  ;;  %v345_v8 = vand.u32 %v1633_v3, %v166_v4  ;;  %v1641_v12 = vld [vmem:[%s2056_s0] ss:$8 sps:$4 sm:$0xff]   ;;  %vm150_vm2 = vcmask 220160  }
   0x4   :  { %v1636_v9 = vld [vmem:[%s2056_s0 + $0x50] ss:$8 sps:$4 sm:$0x3f]   ;;  %v168_v10 = vand.u32 %v1635_v5, %v166_v4  ;;  %v1642_v15 = vld [vmem:[%s2056_s0 + $0x40] ss:$8 sps:$4 sm:$0xff]  }
   0x5   :  { %185 = vmatprep.subr.bf16.mxu0 %v171_v7  ;;  %359 = vmatprep.subr.bf16.mxu1 %v345_v8  ;;  %v342_v14 = vand.u32 %v1636_v9, %v166_v4  ;;  %v1644_v16 = vld [vmem:[%s2056_s0 + $0x30] ss:$8 sps:$4 sm:$0x3f]   ;;  %v1646_v17 = vld [vmem:[%s2056_s0 + $0x34] ss:$8 sps:$4 sm:$0x3f]  }
   0x6   :  { %186 = vmatpush1.bf16.msra.mxu0 %v168_v10  ;;  %v1647_v18 = vld [vmem:[%s2056_s0 + $0x70] ss:$8 sps:$4 sm:$0x3f]   ;;  %v1649_v19 = vld [vmem:[%s2056_s0 + $0x74] ss:$8 sps:$4 sm:$0x3f]   ;;  %v519_v21 = vand.u32 %v1646_v17, %v166_v4  ;;  %v516_v23 = vand.u32 %v1644_v16, %v166_v4 }
   0x7   :  { %360 = vmatpush1.bf16.msra.mxu1 %v342_v14  ;;  %187 = vmatprep.subr.bf16.mxu0 %v1637_v6  ;;  %v1643_v20 = vld [vmem:[%s2057_s1] sm:$0xff]   ;;  %v693_v22 = vand.u32 %v1649_v19, %v166_v4  ;;  %v690_v24 = vand.u32 %v1647_v18, %v166_v4  ;;  %v66_v28 = vld [vmem:[%s2058_s2 + $0x30] sm:$0xff]  ;;  %v1650_v31 = vld [vmem:[%s2057_s1 + $0x8] sm:$0xff]  }
   0x8   :  { %361 = vmatprep.subr.bf16.mxu1 %v1639_v11  ;;  %v1654_v25 = vld [vmem:[%s2056_s0 + $0x24] ss:$8 sps:$4 sm:$0xff]   ;;  %v1652_v27 = vld [vmem:[%s2056_s0 + $0x20] ss:$8 sps:$4 sm:$0xff]   ;;  %104 = vperm.xlu0 %1629, %v66_v28  }
   0x9   :  { %v1657_v26 = vld [vmem:[%s2056_s0 + $0x64] ss:$8 sps:$4 sm:$0xff]   ;;  %v1655_v29 = vld [vmem:[%s2056_s0 + $0x60] ss:$8 sps:$4 sm:$0xff]  }
   0xa   :  { %188 = vmatpush1.bf16.msra.mxu0 %v1641_v12  ;;  %v64_v30 = vld [vmem:[%s2058_s2 + $0x20] sm:$0xff] }
   0xb   :  { %362 = vmatpush1.bf16.msra.mxu1 %v1642_v15  ;;  %533 = vmatprep.subr.bf16.mxu0 %v519_v21 }
   0xc   :  { %707 = vmatprep.subr.bf16.mxu1 %v693_v22 }
   0xd   :  { %1456 = vmatmul.mubr.msk.bf16.vlgmr.msra.gmra.mxu0 %vm150_vm2, %v1643_v20 }
   0xe   :  { %1476 = vmatmul.mubr.msk.bf16.vlgmr.msra.gmra.mxu1 %vm150_vm2, %v1643_v20  ;;  %534 = vmatpush1.bf16.msra.mxu0 %v516_v23 }
   0xf   :  { %708 = vmatpush1.bf16.msra.mxu1 %v690_v24  ;;  %215 = vmatprep.mubr.bf16.mxu0 %v1682_v13 }
  0x10   :  { %389 = vmatprep.mubr.bf16.mxu1 %v1682_v13  ;;  %535 = vmatprep.subr.bf16.mxu0 %v1654_v25 }
  0x11   :  { %709 = vmatprep.subr.bf16.mxu1 %v1657_v26 }
  0x12   :  { %8 = vsyncpa [#allocation7], 0  ;;  %536 = vmatpush1.bf16.msra.mxu0 %v1652_v27  ;;  %94 = vperm.xlu1 %1630, %v64_v30   ;;  %v67_v32 = vld [vmem:[%s2058_s2 + $0x38] sm:$0xff]  ;;  %v65_v33 = vld [vmem:[%s2058_s2 + $0x28] sm:$0xff]  ;;  %vm1432_vm3 = vcmask 0  }
  0x13   :  { %710 = vmatpush1.bf16.msra.mxu1 %v1655_v29  ;;  %109 = vperm.xlu0 %1629, %v67_v32   ;;  %v62_v34 = vld [vmem:[%s2058_s2 + $0x10] sm:$0xff]  ;;  %v63_v35 = vld [vmem:[%s2058_s2 + $0x18] sm:$0xff]  ;;  %v60_v37 = vld [vmem:[%s2058_s2] sm:$0xff] }
  0x14   :  { %v1651_v36 = vld [vmem:[%s2057_s1 + $0x10] sm:$0xff]   ;;  %v61_v38 = vld [vmem:[%s2058_s2 + $0x8] sm:$0xff]  ;;  %v1658_v39 = vld [vmem:[%s2057_s1 + $0x18] sm:$0xff]   ;;  %s1683_s1 = smov [#allocation6]  }
  0x15   :  { %1457 = vmatmul.mubr.msk.bf16.gmra.mxu0 %vm150_vm2, %v1650_v31  ;;  %s1440_s2 = sshll.u32 %s1683_s1, 4  ;;  %s1441_s2 = int_to_ptr.vmem [resolvable:$true] %s1440_s2 }
  0x16   :  { %1477 = vmatmul.mubr.msk.bf16.gmra.mxu1 %vm150_vm2, %v1650_v31  ;;  %225 = vmatprep.mubr.bf16.mxu0 %v1682_v13  ;;  %s1659_s14 = scalar_lea.vmem %s1441_s2, 16  ;;  %s1663_s15 = scalar_lea.vmem %s1441_s2, 32 }
  0x17   :  { %399 = vmatprep.mubr.bf16.mxu1 %v1682_v13  ;;  %99 = vperm.xlu1 %1630, %v65_v33   ;;  %p1660_p0 = scmp.ne.s32.totalorder %s1441_s2, %s1659_s14  ;;  %p1664_p1 = scmp.lt.s32.totalorder %s1441_s2, %s1441_s2 }
  0x18   :  { %84 = vperm.xlu0 %1629, %v62_v34   ;;  %p1665_p2 = scmp.lt.s32.totalorder %s1663_s15, %s1659_s14 }
  0x1a   :  { %p1666_p3 = por %p1665_p2, %p1664_p1 }
  0x1b   :  { %89 = vperm.xlu1 %1630, %v63_v35  }
  0x1c   :  { %74 = vperm.xlu0 %1629, %v60_v37   ;;  %p1667_p4 = pnand %p1666_p3, %p1660_p0 }
  0x1d   :  { %1458 = vmatmul.mubr.msk.bf16.gmra.mxu0 %vm150_vm2, %v1651_v36 }
  0x1e   :  { %1478 = vmatmul.mubr.msk.bf16.gmra.mxu1 %vm150_vm2, %v1651_v36  ;;  %235 = vmatprep.mubr.bf16.mxu0 %v1682_v13 }
  0x1f   :  { %409 = vmatprep.mubr.bf16.mxu1 %v1682_v13  ;;  %79 = vperm.xlu1 %1630, %v61_v38  }
  0x25   :  { %1459 = vmatmul.mubr.msk.bf16.gmra.mxu0 %vm150_vm2, %v1658_v39 }
  0x26   :  { %1479 = vmatmul.mubr.msk.bf16.gmra.mxu1 %vm150_vm2, %v1658_v39  ;;  %553 = vmatprep.mubr.bf16.mxu0 %v1682_v13 }
  0x27   :  { %727 = vmatprep.mubr.bf16.mxu1 %v1682_v13 }
  0x2d   :  { %1496 = vmatmul.mubr.msk.bf16.vlgmr.msra.gmra.mxu0 %vm150_vm2, %v1643_v20 }
  0x2e   :  { %1516 = vmatmul.mubr.msk.bf16.vlgmr.msra.gmra.mxu1 %vm150_vm2, %v1643_v20  ;;  %563 = vmatprep.mubr.bf16.mxu0 %v1682_v13 }
  0x2f   :  { %737 = vmatprep.mubr.bf16.mxu1 %v1682_v13 }
  0x35   :  { %1497 = vmatmul.mubr.msk.bf16.gmra.mxu0 %vm150_vm2, %v1650_v31 }
  0x36   :  { %1517 = vmatmul.mubr.msk.bf16.gmra.mxu1 %vm150_vm2, %v1650_v31  ;;  %573 = vmatprep.mubr.bf16.mxu0 %v1682_v13 }
  0x37   :  { %747 = vmatprep.mubr.bf16.mxu1 %v1682_v13 }
  0x3d   :  { %1498 = vmatmul.mubr.msk.bf16.gmra.mxu0 %vm150_vm2, %v1651_v36 }
  0x3e   :  { %1518 = vmatmul.mubr.msk.bf16.gmra.mxu1 %vm150_vm2, %v1651_v36  ;;  %583 = vmatprep.mubr.bf16.mxu0 %v1682_v13 }
  0x3f   :  { %757 = vmatprep.mubr.bf16.mxu1 %v1682_v13 }
  0x45   :  { %1499 = vmatmul.mubr.msk.bf16.gmra.mxu0 %vm150_vm2, %v1658_v39 }
  0x46   :  { %1519 = vmatmul.mubr.msk.bf16.gmra.mxu1 %vm150_vm2, %v1658_v39 }
  0x83   :  { %v1822_v40 = vpop.permute.xlu0 %104 }
  0x8d   :  { %v1824_v41 = vpop.permute.xlu1 %94 }
  0x8e   :  { %v1826_v42 = vpop.permute.xlu0 %109 }
  0x92   :  { %v1828_v43 = vpop.permute.xlu1 %99 }
  0x93   :  { %v1830_v44 = vpop.permute.xlu0 %84 }
  0x96   :  { %v1832_v45 = vpop.permute.xlu1 %89 }
  0x97   :  { %v1834_v47 = vpop.permute.xlu0 %74 }
  0x9a   :  { %v1836_v50 = vpop.permute.xlu1 %79 }
  0xcd   :  { %v207_v46 = vpop.f32.mrf.mxu0 }
  0xce   :  { %v381_v48 = vpop.f32.mrf.mxu1  ;;  %v208_v52 = vadd.f32 %v207_v46, %v1834_v47 }
  0xcf   :  { %v209_v49 = vpop.f32.mrf.mxu0  ;;  %v382_v54 = vadd.f32 %v381_v48, %v1834_v47 }
  0xd0   :  { %v383_v51 = vpop.f32.mrf.mxu1  ;;  %v210_v55 = vadd.f32 %v209_v49, %v1834_v47  ;;  %v246_v61 = vmax.f32 %v208_v52, 0.0 }
  0xd1   :  { %v211_v53 = vpop.f32.mrf.mxu0  ;;  %v384_v58 = vadd.f32 %v383_v51, %v1834_v47  ;;  %v420_v1 = vmax.f32 %v382_v54, 0.0 }
  0xd2   :  { %v212_v56 = vadd.f32 %v211_v53, %v1836_v50  ;;  %v385_v57 = vpop.f32.mrf.mxu1  ;;  %v247_v5 = vmax.f32 %v210_v55, 0.0 }
  0xd3   :  { %v386_v59 = vadd.f32 %v385_v57, %v1836_v50  ;;  %v213_v60 = vpop.f32.mrf.mxu0  ;;  %v421_v9 = vmax.f32 %v384_v58, 0.0 }
  0xd4   :  { %v248_v62 = vmax.f32 %v212_v56, 0.0  ;;  %v214_v63 = vadd.f32 %v213_v60, %v1836_v50  ;;  %v387_v0 = vpop.f32.mrf.mxu1 }
  0xd5   :  { %v422_v2 = vmax.f32 %v386_v59, 0.0  ;;  %v388_v3 = vadd.f32 %v387_v0, %v1836_v50  ;;  %v217_v4 = vpop.f32.mrf.mxu0 }
  0xd6   :  { %v1846_v6 = vpack.c.bf16 %v248_v62, %v246_v61  ;;  %v249_v7 = vmax.f32 %v214_v63, 0.0  ;;  %v391_v8 = vpop.f32.mrf.mxu1  ;;  %v218_v14 = vadd.f32 %v217_v4, %v1830_v44 }
  0xd7   :  { %v1848_v10 = vpack.c.bf16 %v422_v2, %v420_v1  ;;  %v423_v11 = vmax.f32 %v388_v3, 0.0  ;;  %v219_v12 = vpop.f32.mrf.mxu0  ;;  %v392_v17 = vadd.f32 %v391_v8, %v1830_v44 }
  0xd8   :  { %2071 = vst [vmem:[#allocation9_spill] sm:$0xff] %v1846_v6  ;;  %v1850_v13 = vpack.c.bf16 %v249_v7, %v247_v5  ;;  %v393_v15 = vpop.f32.mrf.mxu1  ;;  %v220_v19 = vadd.f32 %v219_v12, %v1830_v44  ;;  %v250_v25 = vmax.f32 %v218_v14, 0.0 }
  0xd9   :  { %2072 = vst [vmem:[#allocation10_spill] sm:$0xff] %v1848_v10  ;;  %v1853_v16 = vpack.c.bf16 %v423_v11, %v421_v9  ;;  %v221_v18 = vpop.f32.mrf.mxu0  ;;  %v394_v22 = vadd.f32 %v393_v15, %v1830_v44  ;;  %v424_v29 = vmax.f32 %v392_v17, 0.0 }
  0xda   :  { %2073 = vst [vmem:[#allocation11_spill] sm:$0xff] %v1850_v13  ;;  %v222_v20 = vadd.f32 %v221_v18, %v1832_v45  ;;  %v395_v21 = vpop.f32.mrf.mxu1  ;;  %1000 = vmatprep.mubr.bf16.mxu0 %v1850_v13  ;;  %v251_v33 = vmax.f32 %v220_v19, 0.0 }
  0xdb   :  { %2074 = vst [vmem:[#allocation12_spill] sm:$0xff] %v1853_v16  ;;  %v396_v23 = vadd.f32 %v395_v21, %v1832_v45  ;;  %1225 = vmatprep.mubr.bf16.mxu1 %v1853_v16  ;;  %v223_v24 = vpop.f32.mrf.mxu0  ;;  %v425_v37 = vmax.f32 %v394_v22, 0.0 }
  0xdc   :  { %v252_v26 = vmax.f32 %v222_v20, 0.0  ;;  %v224_v27 = vadd.f32 %v223_v24, %v1832_v45  ;;  %v397_v28 = vpop.f32.mrf.mxu1 }
  0xdd   :  { %v426_v30 = vmax.f32 %v396_v23, 0.0  ;;  %v398_v31 = vadd.f32 %v397_v28, %v1832_v45  ;;  %v227_v32 = vpop.f32.mrf.mxu0 }
  0xde   :  { %v1864_v34 = vpack.c.bf16 %v252_v26, %v250_v25  ;;  %v253_v35 = vmax.f32 %v224_v27, 0.0  ;;  %v401_v36 = vpop.f32.mrf.mxu1  ;;  %v228_v49 = vadd.f32 %v227_v32, %v1824_v41 }
  0xdf   :  { %v1866_v38 = vpack.c.bf16 %v426_v30, %v424_v29  ;;  %v427_v39 = vmax.f32 %v398_v31, 0.0  ;;  %v229_v46 = vpop.f32.mrf.mxu0  ;;  %v402_v53 = vadd.f32 %v401_v36, %v1824_v41 }
  0xe0   :  { %2075 = vst [vmem:[#allocation13_spill] sm:$0xff] %v1864_v34  ;;  %v1868_v48 = vpack.c.bf16 %v253_v35, %v251_v33  ;;  %v403_v51 = vpop.f32.mrf.mxu1  ;;  %v230_v55 = vadd.f32 %v229_v46, %v1824_v41  ;;  %v254_v61 = vmax.f32 %v228_v49, 0.0 }
  0xe1   :  { %2076 = vst [vmem:[#allocation14_spill] sm:$0xff] %v1866_v38  ;;  %v1871_v52 = vpack.c.bf16 %v427_v39, %v425_v37  ;;  %v231_v54 = vpop.f32.mrf.mxu0  ;;  %v404_v58 = vadd.f32 %v403_v51, %v1824_v41  ;;  %v428_v1 = vmax.f32 %v402_v53, 0.0 }
  0xe2   :  { %2077 = vst [vmem:[#allocation15_spill] sm:$0xff] %v1868_v48  ;;  %v232_v56 = vadd.f32 %v231_v54, %v1828_v43  ;;  %v405_v57 = vpop.f32.mrf.mxu1  ;;  %v255_v5 = vmax.f32 %v230_v55, 0.0 }
  0xe3   :  { %2078 = vst [vmem:[#allocation16_spill] sm:$0xff] %v1871_v52  ;;  %v406_v59 = vadd.f32 %v405_v57, %v1828_v43  ;;  %v233_v60 = vpop.f32.mrf.mxu0  ;;  %v429_v11 = vmax.f32 %v404_v58, 0.0 }
  0xe4   :  { %v256_v62 = vmax.f32 %v232_v56, 0.0  ;;  %v234_v63 = vadd.f32 %v233_v60, %v1828_v43  ;;  %v407_v0 = vpop.f32.mrf.mxu1 }
  0xe5   :  { %v430_v2 = vmax.f32 %v406_v59, 0.0  ;;  %v408_v3 = vadd.f32 %v407_v0, %v1828_v43  ;;  %v237_v4 = vpop.f32.mrf.mxu0 }
  0xe6   :  { %v1880_v7 = vpack.c.bf16 %v256_v62, %v254_v61  ;;  %v257_v8 = vmax.f32 %v234_v63, 0.0  ;;  %v411_v9 = vpop.f32.mrf.mxu1  ;;  %v238_v18 = vadd.f32 %v237_v4, %v1822_v40 }
  0xe7   :  { %v1882_v12 = vpack.c.bf16 %v430_v2, %v428_v1  ;;  %v431_v14 = vmax.f32 %v408_v3, 0.0  ;;  %v1884_v15 = vpop.f32.mrf.mxu0  ;;  %v412_v21 = vadd.f32 %v411_v9, %v1822_v40 }
  0xe8   :  { %2079 = vst [vmem:[#allocation17_spill] sm:$0xff] %v1880_v7  ;;  %v1886_v17 = vpack.c.bf16 %v257_v8, %v255_v5  ;;  %v1889_v19 = vpop.f32.mrf.mxu1  ;;  %v258_v27 = vmax.f32 %v238_v18, 0.0 }
  0xe9   :  { %2080 = vst [vmem:[#allocation18_spill] sm:$0xff] %v1882_v12  ;;  %v1891_v20 = vpack.c.bf16 %v431_v14, %v429_v11  ;;  %v241_v22 = vpop.f32.mrf.mxu0  ;;  %v432_v30 = vmax.f32 %v412_v21, 0.0 }
  0xea   :  { %v242_v23 = vadd.f32 %v241_v22, %v1826_v42  ;;  %v415_v24 = vpop.f32.mrf.mxu1 }
  0xeb   :  { %2081 = vst [vmem:[#allocation19_spill] sm:$0xff] %v1891_v20  ;;  %v416_v25 = vadd.f32 %v415_v24, %v1826_v42  ;;  %v1896_v26 = vpop.f32.mrf.mxu0 }
  0xec   :  { %v260_v28 = vmax.f32 %v242_v23, 0.0  ;;  %v1898_v29 = vpop.f32.mrf.mxu1 }
  0xed   :  { %v434_v31 = vmax.f32 %v416_v25, 0.0  ;;  %v1900_v32 = vpop.f32.mrf.mxu0 }
  0xee   :  { %v1902_v33 = vpack.c.bf16 %v260_v28, %v258_v27  ;;  %v1904_v35 = vpop.f32.mrf.mxu1 }
  0xef   :  { %v1906_v36 = vpack.c.bf16 %v434_v31, %v432_v30  ;;  %v1908_v37 = vpop.f32.mrf.mxu0 }
  0xf0   :  { %v1910_v39 = vpop.f32.mrf.mxu1 }
  0xf1   :  { %v1912_v46 = vpop.f32.mrf.mxu0 }
  0xf2   :  { %v1914_v49 = vpop.f32.mrf.mxu1 }
  0xf3   :  { %v1916_v51 = vpop.f32.mrf.mxu0 }
  0xf4   :  { %v1918_v53 = vpop.f32.mrf.mxu1 }
  0xf5   :  { %v1920_v54 = vpop.f32.mrf.mxu0 }
  0xf6   :  { %v1922_v55 = vpop.f32.mrf.mxu1 }
  0xf7   :  { %v567_v56 = vpop.f32.mrf.mxu0 }
  0xf8   :  { %v1924_v57 = vpop.f32.mrf.mxu1 }
  0xf9   :  { %v1926_v58 = vpop.f32.mrf.mxu0 }
  0xfa   :  { %v1928_v59 = vpop.f32.mrf.mxu1 }
  0xfb   :  { %v571_v60 = vpop.f32.mrf.mxu0 }
  0xfc   :  { %v745_v61 = vpop.f32.mrf.mxu1 }
  0xfd   :  { %v575_v62 = vpop.f32.mrf.mxu0 }
  0xfe   :  { %v749_v63 = vpop.f32.mrf.mxu1 }
  0xff   :  { %v577_v0 = vpop.f32.mrf.mxu0 }
 0x100   :  { %v751_v1 = vpop.f32.mrf.mxu1  ;;  %v578_v10 = vadd.f32 %v577_v0, %v1824_v41 }
 0x101   :  { %v579_v2 = vpop.f32.mrf.mxu0 }
 0x102   :  { %v753_v3 = vpop.f32.mrf.mxu1  ;;  %v603_v12 = vmax.f32 %v578_v10, 0.0  ;;  %v576_v10 = vadd.f32 %v575_v62, %v1824_v41 }
 0x103   :  { %v581_v4 = vpop.f32.mrf.mxu0 }
 0x104   :  { %v755_v5 = vpop.f32.mrf.mxu1  ;;  %v582_v21 = vadd.f32 %v581_v4, %v1828_v43 }
 0x105   :  { %v585_v8 = vpop.f32.mrf.mxu0  ;;  %v756_v25 = vadd.f32 %v755_v5, %v1828_v43 }
 0x106   :  { %v759_v9 = vpop.f32.mrf.mxu1  ;;  %v586_v27 = vadd.f32 %v585_v8, %v1822_v40  ;;  %v605_v5 = vmax.f32 %v582_v21, 0.0  ;;  %v754_v21 = vadd.f32 %v753_v3, %v1828_v43 }
 0x107   :  { %v587_v11 = vpop.f32.mrf.mxu0  ;;  %v760_v6 = vadd.f32 %v759_v9, %v1822_v40 }
 0x108   :  { %v761_v14 = vpop.f32.mrf.mxu1  ;;  %v588_v22 = vadd.f32 %v587_v11, %v1822_v40  ;;  %v752_v11 = vadd.f32 %v751_v1, %v1824_v41  ;;  %v606_v52 = vmax.f32 %v586_v27, 0.0 }
 0x109   :  { %v589_v18 = vpop.f32.mrf.mxu0  ;;  %v762_v28 = vadd.f32 %v761_v14, %v1822_v40  ;;  %v779_v14 = vmax.f32 %v756_v25, 0.0  ;;  %v780_v0 = vmax.f32 %v760_v6, 0.0  ;;  %v746_v6 = vadd.f32 %v745_v61, %v1832_v45 }
 0x10a   :  { %v590_v23 = vadd.f32 %v589_v18, %v1826_v42  ;;  %v763_v24 = vpop.f32.mrf.mxu1  ;;  %v607_v38 = vmax.f32 %v588_v22, 0.0  ;;  %v777_v9 = vmax.f32 %v752_v11, 0.0  ;;  %v1951_v22 = vpack.c.bf16 %v605_v5, %v603_v12 }
 0x10b   :  { %v764_v30 = vadd.f32 %v763_v24, %v1826_v42  ;;  %v591_v31 = vpop.f32.mrf.mxu0  ;;  %v781_v24 = vmax.f32 %v762_v28, 0.0  ;;  %v778_v12 = vmax.f32 %v754_v21, 0.0  ;;  %v602_v61 = vmax.f32 %v576_v10, 0.0 }
 0x10c   :  { %v592_v4 = vadd.f32 %v591_v31, %v1826_v42  ;;  %v765_v16 = vpop.f32.mrf.mxu1  ;;  %v608_v18 = vmax.f32 %v590_v23, 0.0  ;;  %v580_v31 = vadd.f32 %v579_v2, %v1828_v43  ;;  %v750_v43 = vadd.f32 %v749_v63, %v1824_v41 }
 0x10d   :  { %v766_v13 = vadd.f32 %v765_v16, %v1826_v42  ;;  %v782_v8 = vmax.f32 %v764_v30, 0.0  ;;  %v572_v16 = vadd.f32 %v571_v60, %v1832_v45  ;;  %v775_v60 = vmax.f32 %v746_v6, 0.0 }
 0x10e   :  { %v609_v34 = vmax.f32 %v592_v4, 0.0  ;;  %v1945_v20 = vpack.c.bf16 %v608_v18, %v606_v52  ;;  %v776_v2 = vmax.f32 %v750_v43, 0.0  ;;  %v570_v41 = vadd.f32 %v1926_v58, %v1832_v45 }
 0x10f   :  { %v783_v48 = vmax.f32 %v766_v13, 0.0  ;;  %v1953_v23 = vpack.c.bf16 %v782_v8, %v780_v0  ;;  %v1958_v13 = vpack.c.bf16 %v779_v14, %v777_v9  ;;  %v601_v52 = vmax.f32 %v572_v16, 0.0 }
 0x110   :  { %v1942_v7 = vpack.c.bf16 %v609_v34, %v607_v38  ;;  %v568_v34 = vadd.f32 %v567_v56, %v1830_v44  ;;  %v742_v38 = vadd.f32 %v1924_v57, %v1830_v44  ;;  %v562_v63 = vadd.f32 %v1916_v51, %v1836_v50 }
 0x111   :  { %v1947_v1 = vpack.c.bf16 %v783_v48, %v781_v24  ;;  %v604_v48 = vmax.f32 %v580_v31, 0.0  ;;  %v744_v57 = vadd.f32 %v1928_v59, %v1832_v45  ;;  %v1979_v27 = vpack.c.bf16 %v778_v12, %v776_v2  ;;  %v2087_v12 = vld [vmem:[#allocation13_spill] sm:$0xff] }
 0x112   :  { %968 = vmatprep.subr.bf16.mxu0 %v1942_v7  ;;  %v599_v62 = vmax.f32 %v568_v34, 0.0  ;;  %v773_v3 = vmax.f32 %v742_v38, 0.0  ;;  %v736_v28 = vadd.f32 %v1918_v53, %v1836_v50  ;;  %v566_v30 = vadd.f32 %v1920_v54, %v1830_v44  ;;  %v2091_v2 = vld [vmem:[#allocation9_spill] sm:$0xff] }
 0x113   :  { %1193 = vmatprep.subr.bf16.mxu1 %v1947_v1  ;;  %969 = vmatpush1.bf16.xpose.msra.mxu0 %v1945_v20  ;;  %v1971_v56 = vpack.c.bf16 %v604_v48, %v602_v61  ;;  %v558_v51 = vadd.f32 %v1908_v37, %v1834_v47  ;;  %v740_v45 = vadd.f32 %v1922_v55, %v1830_v44  ;;  %v600_v58 = vmax.f32 %v570_v41, 0.0  ;;  %v2089_v61 = vld [vmem:[#allocation11_spill] sm:$0xff] }
 0x114   :  { %1194 = vmatpush1.bf16.xpose.msra.mxu1 %v1953_v23  ;;  %970 = vmatprep.subr.bf16.mxu0 %v1951_v22  ;;  %v1977_v25 = vpack.c.bf16 %v601_v52, %v599_v62  ;;  %v1985_v4 = vpack.c.bf16 %v775_v60, %v773_v3  ;;  %v732_v53 = vadd.f32 %v1910_v39, %v1834_v47  ;;  %v597_v54 = vmax.f32 %v562_v63, 0.0  ;;  %v2086_v52 = vld [vmem:[#allocation16_spill] sm:$0xff]  ;;  %v2088_v60 = vld [vmem:[#allocation14_spill] sm:$0xff] }
 0x115   :  { %1195 = vmatprep.subr.bf16.mxu1 %v1958_v13  ;;  %v774_v59 = vmax.f32 %v744_v57, 0.0  ;;  %v771_v11 = vmax.f32 %v736_v28, 0.0  ;;  %v598_v18 = vmax.f32 %v566_v30, 0.0  ;;  %v595_v5 = vmax.f32 %v558_v51, 0.0  ;;  %v2090_v62 = vld [vmem:[#allocation12_spill] sm:$0xff]  ;;  %v2092_v3 = vld [vmem:[#allocation10_spill] sm:$0xff] }
 0x116   :  { %v772_v8 = vmax.f32 %v740_v45, 0.0  ;;  %v769_v37 = vmax.f32 %v732_v53, 0.0  ;;  %v560_v44 = vadd.f32 %v1912_v46, %v1836_v50  ;;  %v244_v14 = vadd.f32 %v1896_v26, %v1826_v42 }
 0x117   :  { %v1999_v55 = vpack.c.bf16 %v600_v58, %v598_v18  ;;  %v734_v39 = vadd.f32 %v1914_v49, %v1836_v50  ;;  %v1601_v24 = vpack.c.bf16 %v597_v54, %v595_v5  ;;  %v418_v9 = vadd.f32 %v1898_v29, %v1826_v42 }
 0x118   :  { %v1618_v0 = vpack.c.bf16 %v774_v59, %v772_v8  ;;  %v556_v31 = vadd.f32 %v1900_v32, %v1834_v47  ;;  %v1617_v16 = vpack.c.bf16 %v771_v11, %v769_v37  ;;  %v240_v46 = vadd.f32 %v1884_v15, %v1822_v40 }
 0x119   :  { %v730_v26 = vadd.f32 %v1904_v35, %v1834_v47  ;;  %v414_v50 = vadd.f32 %v1889_v19, %v1822_v40  ;;  %v596_v49 = vmax.f32 %v560_v44, 0.0  ;;  %v261_v42 = vmax.f32 %v244_v14, 0.0  ;;  %v2082_v40 = vld [vmem:[#allocation19_spill] sm:$0xff]  ;;  %v2083_v47 = vld [vmem:[#allocation17_spill] sm:$0xff]  ;;  %v2084_v19 = vld [vmem:[#allocation18_spill] sm:$0xff] }
 0x11a   :  { %v770_v29 = vmax.f32 %v734_v39, 0.0  ;;  %v435_v21 = vmax.f32 %v418_v9, 0.0  ;;  %v594_v32 = vmax.f32 %v556_v31, 0.0  ;;  %v259_v6 = vmax.f32 %v240_v46, 0.0  ;;  %v2085_v35 = vld [vmem:[#allocation15_spill] sm:$0xff] }
 0x11b   :  { %971 = vmatpush1.bf16.xpose.msra.mxu0 %v1971_v56  ;;  %v768_v10 = vmax.f32 %v730_v26, 0.0  ;;  %v433_v34 = vmax.f32 %v414_v50, 0.0 }
 0x11c   :  { %1196 = vmatpush1.bf16.xpose.msra.mxu1 %v1979_v27  ;;  %972 = vmatprep.subr.bf16.mxu0 %v1977_v25  ;;  %v1600_v43 = vpack.c.bf16 %v596_v49, %v594_v32  ;;  %v1599_v38 = vpack.c.bf16 %v261_v42, %v259_v6 }
 0x11d   :  { %1197 = vmatprep.subr.bf16.mxu1 %v1985_v4  ;;  %v1616_v15 = vpack.c.bf16 %v770_v29, %v768_v10  ;;  %v1615_v48 = vpack.c.bf16 %v435_v21, %v433_v34 }
 0x123   :  { %973 = vmatpush1.bf16.xpose.msra.mxu0 %v1999_v55 }
 0x124   :  { %1198 = vmatpush1.bf16.xpose.msra.mxu1 %v1618_v0  ;;  %974 = vmatprep.subr.bf16.mxu0 %v1601_v24 }
 0x125   :  { %1199 = vmatprep.subr.bf16.mxu1 %v1617_v16 }
 0x12b   :  { %975 = vmatpush1.bf16.xpose.msra.mxu0 %v1600_v43 }
 0x12c   :  { %1200 = vmatpush1.bf16.xpose.msra.mxu1 %v1616_v15  ;;  %976 = vmatprep.subr.bf16.mxu0 %v1599_v38 }
 0x12d   :  { %1201 = vmatprep.subr.bf16.mxu1 %v1615_v48 }
 0x133   :  { %977 = vmatpush1.bf16.xpose.msra.mxu0 %v1902_v33 }
 0x134   :  { %1202 = vmatpush1.bf16.xpose.msra.mxu1 %v1906_v36  ;;  %978 = vmatprep.subr.bf16.mxu0 %v1886_v17 }
 0x135   :  { %1203 = vmatprep.subr.bf16.mxu1 %v2082_v40 }
 0x13b   :  { %979 = vmatpush1.bf16.xpose.msra.mxu0 %v2083_v47 }
 0x13c   :  { %1204 = vmatpush1.bf16.xpose.msra.mxu1 %v2084_v19  ;;  %980 = vmatprep.subr.bf16.mxu0 %v2085_v35 }
 0x13d   :  { %1205 = vmatprep.subr.bf16.mxu1 %v2086_v52 }
 0x143   :  { %981 = vmatpush1.bf16.xpose.msra.mxu0 %v2087_v12 }
 0x144   :  { %1206 = vmatpush1.bf16.xpose.msra.mxu1 %v2088_v60  ;;  %982 = vmatprep.subr.bf16.mxu0 %v2089_v61 }
 0x145   :  { %1207 = vmatprep.subr.bf16.mxu1 %v2090_v62 }
 0x14b   :  { %983 = vmatpush1.bf16.xpose.msra.mxu0 %v2091_v2 }
 0x14c   :  { %1208 = vmatpush1.bf16.xpose.msra.mxu1 %v2092_v3 }
 0x152   :  { %1001 = vmatmul.mubr.bf16.vlgmr.msra.gmra.mxu0 %v2091_v2 }
 0x153   :  { %1226 = vmatmul.mubr.bf16.vlgmr.msra.gmra.mxu1 %v2092_v3  ;;  %1008 = vmatprep.mubr.bf16.mxu0 %v2085_v35 }
 0x154   :  { %1233 = vmatprep.mubr.bf16.mxu1 %v2086_v52 }
 0x15a   :  { %1009 = vmatmul.mubr.bf16.gmra.mxu0 %v2087_v12 }
 0x15b   :  { %1234 = vmatmul.mubr.bf16.gmra.mxu1 %v2088_v60  ;;  %1016 = vmatprep.mubr.bf16.mxu0 %v1886_v17 }
 0x15c   :  { %1241 = vmatprep.mubr.bf16.mxu1 %v2082_v40 }
 0x162   :  { %1017 = vmatmul.mubr.bf16.gmra.mxu0 %v2083_v47 }
 0x163   :  { %1242 = vmatmul.mubr.bf16.gmra.mxu1 %v2084_v19  ;;  %1024 = vmatprep.mubr.bf16.mxu0 %v1599_v38 }
 0x164   :  { %1249 = vmatprep.mubr.bf16.mxu1 %v1615_v48 }
 0x16a   :  { %1025 = vmatmul.mubr.bf16.gmra.mxu0 %v1902_v33 }
 0x16b   :  { %1250 = vmatmul.mubr.bf16.gmra.mxu1 %v1906_v36  ;;  %1032 = vmatprep.mubr.bf16.mxu0 %v1601_v24 }
 0x16c   :  { %1257 = vmatprep.mubr.bf16.mxu1 %v1617_v16 }
 0x172   :  { %1033 = vmatmul.mubr.bf16.gmra.mxu0 %v1600_v43 }
 0x173   :  { %1258 = vmatmul.mubr.bf16.gmra.mxu1 %v1616_v15  ;;  %1040 = vmatprep.mubr.bf16.mxu0 %v1977_v25 }
 0x174   :  { %1265 = vmatprep.mubr.bf16.mxu1 %v1985_v4 }
 0x17a   :  { %1041 = vmatmul.mubr.bf16.gmra.mxu0 %v1999_v55 }
 0x17b   :  { %1266 = vmatmul.mubr.bf16.gmra.mxu1 %v1618_v0  ;;  %1048 = vmatprep.mubr.bf16.mxu0 %v1951_v22 }
 0x17c   :  { %1273 = vmatprep.mubr.bf16.mxu1 %v1958_v13 }
 0x182   :  { %1049 = vmatmul.mubr.bf16.gmra.mxu0 %v1971_v56 }
 0x183   :  { %1274 = vmatmul.mubr.bf16.gmra.mxu1 %v1979_v27  ;;  %1056 = vmatprep.mubr.bf16.mxu0 %v1942_v7 }
 0x184   :  { %1281 = vmatprep.mubr.bf16.mxu1 %v1947_v1 }
 0x18a   :  { %1057 = vmatmul.mubr.bf16.gmra.mxu0 %v1945_v20 }
 0x18b   :  { %1282 = vmatmul.mubr.bf16.gmra.mxu1 %v1953_v23 }
 0x212   :  { %v1002_v17 = vpop.f32.mrf.mxu0 }
 0x213   :  { %v1227_v33 = vpop.f32.mrf.mxu1 }
 0x214   :  { %v1004_v36 = vpop.f32.mrf.mxu0  ;;  %v1357_v14 = vsub.f32 %v1002_v17, %v1227_v33 }
 0x215   :  { %v1229_v41 = vpop.f32.mrf.mxu1 }
 0x216   :  { %v1005_v63 = vpop.f32.mrf.mxu0  ;;  %v1373_v26 = vmul.f32 3.0517578e-05, %v1357_v14 }
 0x217   :  { %v1230_v22 = vpop.f32.mrf.mxu1 }
 0x218   :  { %v1007_v57 = vpop.f32.mrf.mxu0  ;;  %v1358_v37 = vsub.f32 %v1005_v63, %v1230_v22  ;;  %v1389_v43 = vmul.f32 %v1373_v26, %v1373_v26 }
 0x219   :  { %v1232_v13 = vpop.f32.mrf.mxu1 }
 0x21a   :  { %v1010_v25 = vpop.f32.mrf.mxu0  ;;  %v1374_v9 = vmul.f32 3.0517578e-05, %v1358_v37 }
 0x21b   :  { %v1235_v56 = vpop.f32.mrf.mxu1 }
 0x21c   :  { %v1012_v28 = vpop.f32.mrf.mxu0  ;;  %v1359_v39 = vsub.f32 %v1010_v25, %v1235_v56  ;;  %v1390_v21 = vmul.f32 %v1374_v9, %v1374_v9 }
 0x21d   :  { %v1237_v27 = vpop.f32.mrf.mxu1 }
 0x21e   :  { %v1013_v30 = vpop.f32.mrf.mxu0  ;;  %v1375_v50 = vmul.f32 3.0517578e-05, %v1359_v39  ;;  %v1405_v19 = vadd.f32 %v1390_v21, %v1389_v43 }
 0x21f   :  { %v1238_v7 = vpop.f32.mrf.mxu1 }
 0x220   :  { %v1015_v4 = vpop.f32.mrf.mxu0  ;;  %v1360_v31 = vsub.f32 %v1013_v30, %v1238_v7  ;;  %v1391_v38 = vmul.f32 %v1375_v50, %v1375_v50 }
 0x221   :  { %v1240_v1 = vpop.f32.mrf.mxu1 }
 0x222   :  { %v1018_v51 = vpop.f32.mrf.mxu0  ;;  %v1376_v32 = vmul.f32 3.0517578e-05, %v1360_v31  ;;  %v1406_v62 = vadd.f32 %v1405_v19, %v1391_v38 }
 0x223   :  { %v1243_v20 = vpop.f32.mrf.mxu1 }
 0x224   :  { %v1020_v45 = vpop.f32.mrf.mxu0  ;;  %v1361_v49 = vsub.f32 %v1018_v51, %v1243_v20  ;;  %v1392_v35 = vmul.f32 %v1376_v32, %v1376_v32 }
 0x225   :  { %v1245_v23 = vpop.f32.mrf.mxu1 }
 0x226   :  { %v1021_v53 = vpop.f32.mrf.mxu0  ;;  %v1377_v15 = vmul.f32 3.0517578e-05, %v1361_v49  ;;  %v1407_v41 = vadd.f32 %v1406_v62, %v1392_v35 }
 0x227   :  { %v1246_v58 = vpop.f32.mrf.mxu1 }
 0x228   :  { %v1023_v54 = vpop.f32.mrf.mxu0  ;;  %v1362_v6 = vsub.f32 %v1021_v53, %v1246_v58  ;;  %v1393_v2 = vmul.f32 %v1377_v15, %v1377_v15 }
 0x229   :  { %v1248_v59 = vpop.f32.mrf.mxu1 }
 0x22a   :  { %v1026_v11 = vpop.f32.mrf.mxu0  ;;  %v1378_v52 = vmul.f32 3.0517578e-05, %v1362_v6  ;;  %v1408_v56 = vadd.f32 %v1407_v41, %v1393_v2 }
 0x22b   :  { %v1251_v18 = vpop.f32.mrf.mxu1 }
 0x22c   :  { %v1028_v5 = vpop.f32.mrf.mxu0  ;;  %v1363_v48 = vsub.f32 %v1026_v11, %v1251_v18  ;;  %v1394_v63 = vmul.f32 %v1378_v52, %v1378_v52 }
 0x22d   :  { %v1253_v8 = vpop.f32.mrf.mxu1 }
 0x22e   :  { %v1029_v44 = vpop.f32.mrf.mxu0  ;;  %v1379_v3 = vmul.f32 3.0517578e-05, %v1363_v48  ;;  %v1409_v1 = vadd.f32 %v1408_v56, %v1394_v63 }
 0x22f   :  { %v1254_v55 = vpop.f32.mrf.mxu1 }
 0x230   :  { %v1031_v24 = vpop.f32.mrf.mxu0  ;;  %v1364_v12 = vsub.f32 %v1029_v44, %v1254_v55  ;;  %v1395_v28 = vmul.f32 %v1379_v3, %v1379_v3 }
 0x231   :  { %v1256_v0 = vpop.f32.mrf.mxu1 }
 0x232   :  { %v1034_v16 = vpop.f32.mrf.mxu0  ;;  %v1380_v22 = vmul.f32 3.0517578e-05, %v1364_v12  ;;  %v1410_v58 = vadd.f32 %v1409_v1, %v1395_v28 }
 0x233   :  { %v1259_v46 = vpop.f32.mrf.mxu1 }
 0x234   :  { %v1036_v42 = vpop.f32.mrf.mxu0  ;;  %v1365_v17 = vsub.f32 %v1034_v16, %v1259_v46  ;;  %v1396_v51 = vmul.f32 %v1380_v22, %v1380_v22 }
 0x235   :  { %v1261_v29 = vpop.f32.mrf.mxu1 }
 0x236   :  { %v1037_v10 = vpop.f32.mrf.mxu0  ;;  %v1381_v27 = vmul.f32 3.0517578e-05, %v1365_v17  ;;  %v1411_v8 = vadd.f32 %v1410_v58, %v1396_v51 }
 0x237   :  { %v1262_v34 = vpop.f32.mrf.mxu1 }
 0x238   :  { %v1039_v40 = vpop.f32.mrf.mxu0  ;;  %v1366_v57 = vsub.f32 %v1037_v10, %v1262_v34  ;;  %v1397_v54 = vmul.f32 %v1381_v27, %v1381_v27 }
 0x239   :  { %v1264_v47 = vpop.f32.mrf.mxu1 }
 0x23a   :  { %v1042_v60 = vpop.f32.mrf.mxu0  ;;  %v1382_v20 = vmul.f32 3.0517578e-05, %v1366_v57  ;;  %v1412_v39 = vadd.f32 %v1411_v8, %v1397_v54 }
 0x23b   :  { %v1267_v61 = vpop.f32.mrf.mxu1 }
 0x23c   :  { %v1044_v33 = vpop.f32.mrf.mxu0  ;;  %v1367_v30 = vsub.f32 %v1042_v60, %v1267_v61  ;;  %v1398_v37 = vmul.f32 %v1382_v20, %v1382_v20 }
 0x23d   :  { %v1269_v36 = vpop.f32.mrf.mxu1 }
 0x23e   :  { %v1045_v13 = vpop.f32.mrf.mxu0  ;;  %v1383_v59 = vmul.f32 3.0517578e-05, %v1367_v30  ;;  %v1413_v46 = vadd.f32 %v1412_v39, %v1398_v37 }
 0x23f   :  { %v1270_v25 = vpop.f32.mrf.mxu1 }
 0x240   :  { %v1047_v7 = vpop.f32.mrf.mxu0  ;;  %v1368_v45 = vsub.f32 %v1045_v13, %v1270_v25  ;;  %v1399_v24 = vmul.f32 %v1383_v59, %v1383_v59 }
 0x241   :  { %v1272_v4 = vpop.f32.mrf.mxu1 }
 0x242   :  { %v1050_v23 = vpop.f32.mrf.mxu0  ;;  %v1384_v44 = vmul.f32 3.0517578e-05, %v1368_v45  ;;  %v1414_v29 = vadd.f32 %v1413_v46, %v1399_v24 }
 0x243   :  { %v1275_v53 = vpop.f32.mrf.mxu1 }
 0x244   :  { %v1369_v11 = vsub.f32 %v1050_v23, %v1275_v53  ;;  %v1052_v18 = vpop.f32.mrf.mxu0  ;;  %v1400_v26 = vmul.f32 %v1384_v44, %v1384_v44 }
 0x245   :  { %v1277_v5 = vpop.f32.mrf.mxu1 }
 0x246   :  { %v1053_v55 = vpop.f32.mrf.mxu0  ;;  %v1385_v0 = vmul.f32 3.0517578e-05, %v1369_v11  ;;  %v1415_v34 = vadd.f32 %v1414_v29, %v1400_v26 }
 0x247   :  { %v1278_v14 = vpop.f32.mrf.mxu1 }
 0x248   :  { %v1370_v9 = vsub.f32 %v1053_v55, %v1278_v14  ;;  %v1055_v31 = vpop.f32.mrf.mxu0  ;;  %v1401_v21 = vmul.f32 %v1385_v0, %v1385_v0 }
 0x249   :  { %v1280_v16 = vpop.f32.mrf.mxu1 }
 0x24a   :  { %v1386_v50 = vmul.f32 3.0517578e-05, %v1370_v9  ;;  %v1058_v49 = vpop.f32.mrf.mxu0  ;;  %v1416_v40 = vadd.f32 %v1415_v34, %v1401_v21 }
 0x24b   :  { %v1283_v42 = vpop.f32.mrf.mxu1 }
 0x24c   :  { %v1371_v32 = vsub.f32 %v1058_v49, %v1283_v42  ;;  %v1060_v6 = vpop.f32.mrf.mxu0  ;;  %v1402_v43 = vmul.f32 %v1386_v50, %v1386_v50 }
 0x24d   :  { %v1285_v10 = vpop.f32.mrf.mxu1 }
 0x24e   :  { %v1387_v38 = vmul.f32 3.0517578e-05, %v1371_v32  ;;  %v1061_v15 = vpop.f32.mrf.mxu0  ;;  %v1417_v12 = vadd.f32 %v1416_v40, %v1402_v43 }
 0x24f   :  { %v1286_v48 = vpop.f32.mrf.mxu1 }
 0x250   :  { %v1403_v47 = vmul.f32 %v1387_v38, %v1387_v38  ;;  %v1372_v19 = vsub.f32 %v1061_v15, %v1286_v48  ;;  %v1063_v35 = vpop.f32.mrf.mxu0 }
 0x251   :  { %v1288_v52 = vpop.f32.mrf.mxu1 }
 0x252   :  { %v1388_v60 = vmul.f32 3.0517578e-05, %v1372_v19  ;;  %v1418_v62 = vadd.f32 %v1417_v12, %v1403_v47 }
 0x254   :  { %v1404_v61 = vmul.f32 %v1388_v60, %v1388_v60 }
 0x256   :  { %v1419_v2 = vadd.f32 %v1418_v62, %v1404_v61 }
 0x258   :  { %1420 = vadd.xlane.f32.xlu0 %v1419_v2 }
 0x2e1   :  { %v1421_v3 = vpop.xlane.xlu0 %1420 }
 0x2e2   :  { %v1422_v17 = vrot.slane %v1421_v3, 4 }
 0x2e4   :  { %v1423_v33 = vadd.f32 %v1422_v17, %v1421_v3 }
 0x2e6   :  { %v1424_v36 = vrot.slane %v1423_v33, 2 }
 0x2e8   :  { %v1425_v41 = vadd.f32 %v1424_v36, %v1423_v33 }
 0x2ea   :  { %v1426_v63 = vrot.slane %v1425_v41, 1 }
 0x2ec   :  { %v1427_v22 = vadd.f32 %v1426_v63, %v1425_v41 }
 0x2ee   :  { %1624 = vpush %v1427_v22 }
 0x31f   :  { %s1625_s13 = spop %1624 }
 0x320   :  { %v1429_v57 = vstv %s1625_s13 }
 0x321   :  { %v1431_v13 = vmul.f32 6.1035156e-05, %v1429_v57 }
 0x323   :  { %1433 = vst.msk [vmem:[#allocation6] sm:$0x1] %vm1432_vm3, %v1431_v13 }
 0x324   :  { %1670 = shalt.err (!%p1667_p4)
}
 0x325   :  { %1443 = dma.vmem_to_hbm [thread:$0]  %s1441_s2, 16, %s2059_s3, [#allocation7]  }
 0x326   :  { %1679 = dma.done.wait [#allocation7], 16  }
 0x327   :  { %1680 = vsyncadd [#allocation7], 4294967280 }
 0x328   :  { %1447 = vsyncpa [#allocation7], 1 }

</bundles_post_ra>
